<compile_context>
chip_gen: v5e
topology: v5e:2x2
jax: 0.10.0
libtpu: 0.0.40
codegen_flags: <defaults>
</compile_context>

<pallas_src>
import functools

import jax
import jax.numpy as jnp
from jax.experimental import pallas as pl
from jax.experimental.pallas import tpu as pltpu


def _round_up(x, m):
    return (x + m - 1) // m * m


# Conservative resident-set budget for the fused path: fits v7x's 64 MiB physical VMEM
# with headroom (v5e/v6e have 128 MiB, so this is safe everywhere).
_FUSED_VMEM_BUDGET = 40 * 1024 * 1024
_VMEM_LIMIT_BYTES = 64 * 1024 * 1024


# -----------------------------------------------------------------------------
# Fused whole-stack kernel (small graphs: everything resident in VMEM once).
# -----------------------------------------------------------------------------
def _gnn_fused_kernel(adj_ref, x_ref, wl_ref, wr_ref, b_ref, o_ref, *, num_layers):
    """Whole SAGEConv stack in one kernel invocation.

    adj_ref: (Np, Np)     bf16  adj[dst, src] = edge multiplicity (exact for <= 256)
    x_ref:   (Np, Dp)     bf16  zero-padded node features
    wl_ref:  (L, Dp, Dp)  bf16  neighbour-projection weights, zero-padded
    wr_ref:  (L, Dp, Dp)  bf16  self-projection weights, zero-padded
    b_ref:   (L, 1, Dp)   f32   biases, zero-padded
    o_ref:   (Np, Dp)     f32   lane-dense padded output
    """
    adj = adj_ref[...]                     # loaded once, reused by every layer
    h = x_ref[...]                         # bf16, carried across layers
    for layer in range(num_layers):        # static unroll; padded shapes are uniform
        # Sum aggregation over neighbours: bf16 x bf16 -> f32 on the MXU.
        agg = jnp.dot(adj, h, preferred_element_type=jnp.float32)
        # Two accumulating bf16 projections (no (Np, 2*Dp) concat copy).
        out = (
            jnp.dot(agg.astype(jnp.bfloat16), wl_ref[layer],
                    preferred_element_type=jnp.float32)
            + jnp.dot(h, wr_ref[layer], preferred_element_type=jnp.float32)
            + b_ref[layer]
        )
        if layer < num_layers - 1:
            # ReLU on the f32 accumulator, then one cast to bf16 for the next layer.
            h = jnp.maximum(out, 0.0).astype(jnp.bfloat16)
        else:
            o_ref[...] = out.astype(o_ref.dtype)


# -----------------------------------------------------------------------------
# Per-layer kernel, tiled over destination-row strips (larger graphs).
# -----------------------------------------------------------------------------
def _sage_layer_kernel(adj_ref, h_all_ref, h_self_ref, wl_ref, wr_ref, b_ref, o_ref,
                       *, last):
    """
    adj_ref:    (TM, Np)  bf16  adjacency strip for this destination-row block
    h_all_ref:  (Np, Dp)  bf16  all source-node features (neighbour term)
    h_self_ref: (TM, Dp)  bf16  this block's own node features (self term)
    wl_ref/wr_ref: (Dp, Dp) bf16 ; b_ref: (1, Dp) f32 ; o_ref: (TM, Dp) bf16/f32
    """
    agg = jnp.dot(adj_ref[...], h_all_ref[...], preferred_element_type=jnp.float32)
    out = (
        jnp.dot(agg.astype(jnp.bfloat16), wl_ref[...],
                preferred_element_type=jnp.float32)
        + jnp.dot(h_self_ref[...], wr_ref[...], preferred_element_type=jnp.float32)
        + b_ref[...]
    )
    if not last:
        out = jnp.maximum(out, 0.0)
    o_ref[...] = out.astype(o_ref.dtype)


def _pad_params(params, d_pad):
    wl_list, wr_list, b_list = [], [], []
    for (w_l, w_r, b) in params:
        di, do = w_l.shape
        wl_list.append(jnp.zeros((d_pad, d_pad), jnp.bfloat16)
                       .at[:di, :do].set(w_l.astype(jnp.bfloat16)))
        wr_list.append(jnp.zeros((d_pad, d_pad), jnp.bfloat16)
                       .at[:di, :do].set(w_r.astype(jnp.bfloat16)))
        b_list.append(jnp.zeros((1, d_pad), jnp.float32)
                      .at[:, :do].set(b.reshape(1, do).astype(jnp.float32)))
    return jnp.stack(wl_list), jnp.stack(wr_list), jnp.stack(b_list)


def gnn_forward(in_feat, edge_index, params, *, force_tiled=False, tm=256):
    """Full GNNModel forward (SAGEConv stack, residual=False, l_norm=False, eval)."""
    n, d_in = in_feat.shape
    num_layers = len(params)
    d_out = params[-1][0].shape[1]

    # Lane-dense padding: common feature width and node count rounded to 128.
    d_pad = _round_up(max([d_in] + [w_l.shape[1] for (w_l, _, _) in params]), 128)
    n_pad = _round_up(n, 128)

    # Dense adjacency adj[dst, src] += 1, built directly in bf16 (no f32 Np^2 temp).
    # NOTE: bf16 is exact only for edge multiplicities <= 256 (fine for typical graphs).
    src, dst = edge_index[0], edge_index[1]
    adj = (jnp.zeros((n_pad, n_pad), jnp.bfloat16)
           .at[dst, src].add(jnp.ones(src.shape, jnp.bfloat16)))

    x = (jnp.zeros((n_pad, d_pad), jnp.bfloat16)
         .at[:n, :d_in].set(in_feat.astype(jnp.bfloat16)))

    wl, wr, b = _pad_params(params, d_pad)
    L = num_layers

    # Resident-set estimate for the fused (gridless) path.
    fused_bytes = (2 * n_pad * n_pad                       # adj bf16
                   + (2 + 2 + 4 + 4 + 4) * n_pad * d_pad   # x, h, agg, out, o
                   + 2 * 2 * L * d_pad * d_pad             # weights bf16
                   + 4 * L * d_pad)                        # bias
    use_fused = (not force_tiled) and fused_bytes <= _FUSED_VMEM_BUDGET

    if use_fused:
        flops = 2 * L * (n_pad * n_pad * d_pad + 2 * n_pad * d_pad * d_pad)
        bytes_accessed = (2 * n_pad * n_pad + 2 * n_pad * d_pad
                          + 4 * L * d_pad * d_pad + 4 * L * d_pad
                          + 4 * n_pad * d_pad)
        out_pad = pl.pallas_call(
            functools.partial(_gnn_fused_kernel, num_layers=num_layers),
            out_shape=jax.ShapeDtypeStruct((n_pad, d_pad), jnp.float32),
            in_specs=[pl.BlockSpec(memory_space=pltpu.VMEM)] * 5,
            out_specs=pl.BlockSpec(memory_space=pltpu.VMEM),
            compiler_params=pltpu.CompilerParams(
                vmem_limit_bytes=_VMEM_LIMIT_BYTES),
            cost_estimate=pl.CostEstimate(flops=flops, transcendentals=0,
                                          bytes_accessed=bytes_accessed),
        )(adj, x, wl, wr, b)
        return out_pad[:n, :d_out]

    # ---------------- Tiled per-layer path (row-strip grid, both TCs) ----------------
    tm = min(tm, n_pad)
    while n_pad % tm:
        tm //= 2
    grid = (n_pad // tm,)

    h = x
    for layer in range(num_layers):
        last = layer == num_layers - 1
        out_dtype = jnp.float32 if last else jnp.bfloat16
        out_bytes = 4 if last else 2
        flops = 2 * (n_pad * n_pad * d_pad + 2 * n_pad * d_pad * d_pad)
        bytes_accessed = (2 * n_pad * n_pad
                          + 2 * n_pad * d_pad * (grid[0] + 1)
                          + 2 * 2 * d_pad * d_pad + 4 * d_pad
                          + out_bytes * n_pad * d_pad)
        h = pl.pallas_call(
            functools.partial(_sage_layer_kernel, last=last),
            out_shape=jax.ShapeDtypeStruct((n_pad, d_pad), out_dtype),
            grid=grid,
            in_specs=[
                pl.BlockSpec((tm, n_pad), lambda i: (i, 0)),      # adj strip (streamed)
                pl.BlockSpec((n_pad, d_pad), lambda i: (0, 0)),   # full h (neighbours)
                pl.BlockSpec((tm, d_pad), lambda i: (i, 0)),      # self rows
                pl.BlockSpec((d_pad, d_pad), lambda i: (0, 0)),   # W_l
                pl.BlockSpec((d_pad, d_pad), lambda i: (0, 0)),   # W_r
                pl.BlockSpec((1, d_pad), lambda i: (0, 0)),       # bias
            ],
            out_specs=pl.BlockSpec((tm, d_pad), lambda i: (i, 0)),
            compiler_params=pltpu.CompilerParams(
                dimension_semantics=("parallel",),
                vmem_limit_bytes=_VMEM_LIMIT_BYTES),
            cost_estimate=pl.CostEstimate(flops=flops, transcendentals=0,
                                          bytes_accessed=bytes_accessed),
        )(adj, h, h, wl[layer], wr[layer], b[layer])
    return h[:n, :d_out]


def init_params(key, input_dim, hidden_dim, out_dim, num_layers):
    """Deterministic SAGEConv parameter init (glorot-ish scaling)."""
    dims = [input_dim] + [hidden_dim] * (num_layers - 1) + [out_dim]
    params = []
    for layer_idx in range(num_layers):
        d_in, d_out = dims[layer_idx], dims[layer_idx + 1]
        key, k1, k2 = jax.random.split(key, 3)
        scale = 1.0 / jnp.sqrt(jnp.float32(d_in))
        w_l = jax.random.normal(k1, (d_in, d_out), jnp.float32) * scale
        w_r = jax.random.normal(k2, (d_in, d_out), jnp.float32) * scale
        b = jnp.zeros((1, d_out), jnp.float32)
        params.append((w_l, w_r, b))
    return params


def gnn_forward_reference(in_feat, edge_index, params):
    """Pure-JAX f32 reference for correctness checking."""
    n = in_feat.shape[0]
    src, dst = edge_index[0], edge_index[1]
    adj = jnp.zeros((n, n), jnp.float32).at[dst, src].add(1.0)
    h = in_feat.astype(jnp.float32)
    for i, (w_l, w_r, b) in enumerate(params):
        h = adj @ h @ w_l + h @ w_r + b
        if i < len(params) - 1:
            h = jnp.maximum(h, 0.0)
    return h


if __name__ == "__main__":
    key = jax.random.PRNGKey(0)
    k_feat, k_edges, k_params, k_feat2, k_edges2 = jax.random.split(key, 5)

    INPUT_DIM = 8
    HIDDEN_DIM = 32
    OUT_DIM = 8
    NUM_LAYERS = 3
    params = init_params(k_params, INPUT_DIM, HIDDEN_DIM, OUT_DIM, NUM_LAYERS)

    # --- small graph: exercises the fused whole-stack kernel ---
    N1, E1 = 16, 32
    in_feat1 = jax.random.normal(k_feat, (N1, INPUT_DIM), jnp.float32)
    edge_index1 = jax.random.randint(k_edges, (2, E1), 0, N1, jnp.int32)
    out1 = jax.block_until_ready(gnn_forward(in_feat1, edge_index1, params))
    ref1 = gnn_forward_reference(in_feat1, edge_index1, params)
    assert out1.shape == (N1, OUT_DIM)
    assert jnp.all(jnp.isfinite(out1))
    # bf16 weights/activations with f32 accumulation => small error vs f32 reference.
    assert jnp.allclose(out1, ref1, rtol=1e-1, atol=1e-1), \
        float(jnp.max(jnp.abs(out1 - ref1)))

    # --- slightly larger graph: exercises the row-strip grid ("parallel") path ---
    N2, E2 = 200, 400
    in_feat2 = jax.random.normal(k_feat2, (N2, INPUT_DIM), jnp.float32)
    edge_index2 = jax.random.randint(k_edges2, (2, E2), 0, N2, jnp.int32)
    out2 = jax.block_until_ready(
        gnn_forward(in_feat2, edge_index2, params, force_tiled=True, tm=128))
    ref2 = gnn_forward_reference(in_feat2, edge_index2, params)
    assert out2.shape == (N2, OUT_DIM)
    assert jnp.all(jnp.isfinite(out2))
    assert jnp.allclose(out2, ref2, rtol=1e-1, atol=1e-1), \
        float(jnp.max(jnp.abs(out2 - ref2)))

    print("KERNEL_OK")
</pallas_src>

<mosaic_0001>
module attributes {stable_mosaic.version = 11 : i64} {
  func.func @_gnn_fused_kernel(%arg0: memref<128x128xbf16, #tpu.memory_space<vmem>>, %arg1: memref<128x128xbf16, #tpu.memory_space<vmem>>, %arg2: memref<3x128x128xbf16, #tpu.memory_space<vmem>>, %arg3: memref<3x128x128xbf16, #tpu.memory_space<vmem>>, %arg4: memref<3x1x128xf32, #tpu.memory_space<vmem>>, %arg5: memref<128x128xf32, #tpu.memory_space<vmem>>) attributes {dimension_semantics = [], scalar_prefetch = 0 : i64, scratch_operands = 0 : i64, tpu.core_type = #tpu.core_type<tc>} {
    %c0 = arith.constant 0 : index
    %c0_0 = arith.constant 0 : index
    %0 = vector.load %arg0[%c0, %c0_0] : memref<128x128xbf16, #tpu.memory_space<vmem>>, vector<128x128xbf16>
    %c0_1 = arith.constant 0 : index
    %c0_2 = arith.constant 0 : index
    %1 = vector.load %arg1[%c0_1, %c0_2] : memref<128x128xbf16, #tpu.memory_space<vmem>>, vector<128x128xbf16>
    %cst = arith.constant dense<0.000000e+00> : vector<128x128xf32>
    %2 = tpu.matmul %0, %1, %cst {dimension_numbers = #tpu.dot_dimension_numbers<[1], [0], [0], [1], [0, 0, 1, 1], [], []>} : vector<128x128xbf16>, vector<128x128xbf16>, vector<128x128xf32> -> vector<128x128xf32>
    %3 = arith.truncf %2 : vector<128x128xf32> to vector<128x128xbf16>
    %c0_3 = arith.constant 0 : index
    %c0_4 = arith.constant 0 : index
    %c0_5 = arith.constant 0 : index
    %4 = vector.load %arg2[%c0_3, %c0_4, %c0_5] : memref<3x128x128xbf16, #tpu.memory_space<vmem>>, vector<1x128x128xbf16>
    %5 = vector.shape_cast %4 : vector<1x128x128xbf16> to vector<128x128xbf16>
    %cst_6 = arith.constant dense<0.000000e+00> : vector<128x128xf32>
    %6 = tpu.matmul %3, %5, %cst_6 {dimension_numbers = #tpu.dot_dimension_numbers<[1], [0], [0], [1], [0, 0, 1, 1], [], []>} : vector<128x128xbf16>, vector<128x128xbf16>, vector<128x128xf32> -> vector<128x128xf32>
    %c0_7 = arith.constant 0 : index
    %c0_8 = arith.constant 0 : index
    %c0_9 = arith.constant 0 : index
    %7 = vector.load %arg3[%c0_7, %c0_8, %c0_9] : memref<3x128x128xbf16, #tpu.memory_space<vmem>>, vector<1x128x128xbf16>
    %8 = vector.shape_cast %7 : vector<1x128x128xbf16> to vector<128x128xbf16>
    %cst_10 = arith.constant dense<0.000000e+00> : vector<128x128xf32>
    %9 = tpu.matmul %1, %8, %cst_10 {dimension_numbers = #tpu.dot_dimension_numbers<[1], [0], [0], [1], [0, 0, 1, 1], [], []>} : vector<128x128xbf16>, vector<128x128xbf16>, vector<128x128xf32> -> vector<128x128xf32>
    %10 = arith.addf %6, %9 : vector<128x128xf32>
    %c0_11 = arith.constant 0 : index
    %c0_12 = arith.constant 0 : index
    %c0_13 = arith.constant 0 : index
    %11 = vector.load %arg4[%c0_11, %c0_12, %c0_13] : memref<3x1x128xf32, #tpu.memory_space<vmem>>, vector<1x1x128xf32>
    %12 = vector.shape_cast %11 : vector<1x1x128xf32> to vector<1x128xf32>
    %13 = vector.broadcast %12 : vector<1x128xf32> to vector<128x128xf32>
    %14 = arith.addf %10, %13 : vector<128x128xf32>
    %cst_14 = arith.constant 0.000000e+00 : f32
    %15 = vector.broadcast %cst_14 : f32 to vector<128x128xf32>
    %16 = arith.maximumf %14, %15 : vector<128x128xf32>
    %17 = arith.truncf %16 : vector<128x128xf32> to vector<128x128xbf16>
    %cst_15 = arith.constant dense<0.000000e+00> : vector<128x128xf32>
    %18 = tpu.matmul %0, %17, %cst_15 {dimension_numbers = #tpu.dot_dimension_numbers<[1], [0], [0], [1], [0, 0, 1, 1], [], []>} : vector<128x128xbf16>, vector<128x128xbf16>, vector<128x128xf32> -> vector<128x128xf32>
    %19 = arith.truncf %18 : vector<128x128xf32> to vector<128x128xbf16>
    %c1 = arith.constant 1 : index
    %c0_16 = arith.constant 0 : index
    %c0_17 = arith.constant 0 : index
    %20 = vector.load %arg2[%c1, %c0_16, %c0_17] : memref<3x128x128xbf16, #tpu.memory_space<vmem>>, vector<1x128x128xbf16>
    %21 = vector.shape_cast %20 : vector<1x128x128xbf16> to vector<128x128xbf16>
    %cst_18 = arith.constant dense<0.000000e+00> : vector<128x128xf32>
    %22 = tpu.matmul %19, %21, %cst_18 {dimension_numbers = #tpu.dot_dimension_numbers<[1], [0], [0], [1], [0, 0, 1, 1], [], []>} : vector<128x128xbf16>, vector<128x128xbf16>, vector<128x128xf32> -> vector<128x128xf32>
    %c1_19 = arith.constant 1 : index
    %c0_20 = arith.constant 0 : index
    %c0_21 = arith.constant 0 : index
    %23 = vector.load %arg3[%c1_19, %c0_20, %c0_21] : memref<3x128x128xbf16, #tpu.memory_space<vmem>>, vector<1x128x128xbf16>
    %24 = vector.shape_cast %23 : vector<1x128x128xbf16> to vector<128x128xbf16>
    %cst_22 = arith.constant dense<0.000000e+00> : vector<128x128xf32>
    %25 = tpu.matmul %17, %24, %cst_22 {dimension_numbers = #tpu.dot_dimension_numbers<[1], [0], [0], [1], [0, 0, 1, 1], [], []>} : vector<128x128xbf16>, vector<128x128xbf16>, vector<128x128xf32> -> vector<128x128xf32>
    %26 = arith.addf %22, %25 : vector<128x128xf32>
    %c1_23 = arith.constant 1 : index
    %c0_24 = arith.constant 0 : index
    %c0_25 = arith.constant 0 : index
    %27 = vector.load %arg4[%c1_23, %c0_24, %c0_25] : memref<3x1x128xf32, #tpu.memory_space<vmem>>, vector<1x1x128xf32>
    %28 = vector.shape_cast %27 : vector<1x1x128xf32> to vector<1x128xf32>
    %29 = vector.broadcast %28 : vector<1x128xf32> to vector<128x128xf32>
    %30 = arith.addf %26, %29 : vector<128x128xf32>
    %cst_26 = arith.constant 0.000000e+00 : f32
    %31 = vector.broadcast %cst_26 : f32 to vector<128x128xf32>
    %32 = arith.maximumf %30, %31 : vector<128x128xf32>
    %33 = arith.truncf %32 : vector<128x128xf32> to vector<128x128xbf16>
    %cst_27 = arith.constant dense<0.000000e+00> : vector<128x128xf32>
    %34 = tpu.matmul %0, %33, %cst_27 {dimension_numbers = #tpu.dot_dimension_numbers<[1], [0], [0], [1], [0, 0, 1, 1], [], []>} : vector<128x128xbf16>, vector<128x128xbf16>, vector<128x128xf32> -> vector<128x128xf32>
    %35 = arith.truncf %34 : vector<128x128xf32> to vector<128x128xbf16>
    %c2 = arith.constant 2 : index
    %c0_28 = arith.constant 0 : index
    %c0_29 = arith.constant 0 : index
    %36 = vector.load %arg2[%c2, %c0_28, %c0_29] : memref<3x128x128xbf16, #tpu.memory_space<vmem>>, vector<1x128x128xbf16>
    %37 = vector.shape_cast %36 : vector<1x128x128xbf16> to vector<128x128xbf16>
    %cst_30 = arith.constant dense<0.000000e+00> : vector<128x128xf32>
    %38 = tpu.matmul %35, %37, %cst_30 {dimension_numbers = #tpu.dot_dimension_numbers<[1], [0], [0], [1], [0, 0, 1, 1], [], []>} : vector<128x128xbf16>, vector<128x128xbf16>, vector<128x128xf32> -> vector<128x128xf32>
    %c2_31 = arith.constant 2 : index
    %c0_32 = arith.constant 0 : index
    %c0_33 = arith.constant 0 : index
    %39 = vector.load %arg3[%c2_31, %c0_32, %c0_33] : memref<3x128x128xbf16, #tpu.memory_space<vmem>>, vector<1x128x128xbf16>
    %40 = vector.shape_cast %39 : vector<1x128x128xbf16> to vector<128x128xbf16>
    %cst_34 = arith.constant dense<0.000000e+00> : vector<128x128xf32>
    %41 = tpu.matmul %33, %40, %cst_34 {dimension_numbers = #tpu.dot_dimension_numbers<[1], [0], [0], [1], [0, 0, 1, 1], [], []>} : vector<128x128xbf16>, vector<128x128xbf16>, vector<128x128xf32> -> vector<128x128xf32>
    %42 = arith.addf %38, %41 : vector<128x128xf32>
    %c2_35 = arith.constant 2 : index
    %c0_36 = arith.constant 0 : index
    %c0_37 = arith.constant 0 : index
    %43 = vector.load %arg4[%c2_35, %c0_36, %c0_37] : memref<3x1x128xf32, #tpu.memory_space<vmem>>, vector<1x1x128xf32>
    %44 = vector.shape_cast %43 : vector<1x1x128xf32> to vector<1x128xf32>
    %45 = vector.broadcast %44 : vector<1x128xf32> to vector<128x128xf32>
    %46 = arith.addf %42, %45 : vector<128x128xf32>
    %c0_38 = arith.constant 0 : index
    %c0_39 = arith.constant 0 : index
    %47 = vector.load %arg5[%c0_38, %c0_39] : memref<128x128xf32, #tpu.memory_space<vmem>>, vector<128x128xf32>
    tpu.vector_store %arg5[%c0_38, %c0_39], %46 {strides = array<i32>} : memref<128x128xf32, #tpu.memory_space<vmem>>, vector<128x128xf32>,
    return
  }
}

</mosaic_0001>

<bundles_post_ra>
// kernel: tpu_custom_call.1
= control target key start
LH: loop header
LB: loop body
LE: loop exit
PB: predicated region body
PF: predicated region fallthrough
CT: control target
= control target key end

     0   :  { %10 = vsyncpa [#allocation3], 0  ;;  %s1921_s0 = inlined_call_operand.hbm [shape: bf16[128,128], index: 0, kind: input, shape index: {}]   ;;  %s1922_s1 = inlined_call_operand.hbm [shape: bf16[128,128], index: 1, kind: input, shape index: {}]   ;;  %s1923_s2 = inlined_call_operand.hbm [shape: bf16[3,128,128], index: 2, kind: input, shape index: {}]   ;;  %s1924_s3 = inlined_call_operand.hbm [shape: bf16[3,128,128], index: 3, kind: input, shape index: {}]   ;;  %s1925_s4 = inlined_call_operand.vmem [shape: f32[3,1,128], index: 4, kind: input, shape index: {}]   ;;  %s1926_s5 = inlined_call_operand.hbm [shape: f32[128,128], index: 5, kind: output, shape index: {}]  }
   0x1   :  { %11 = vsyncpa [#allocation6], 0 }
   0x2   :  { %12 = vsyncpa [#allocation9], 0 }
   0x3   :  { %13 = vsyncpa [#allocation4], 0  ;;  %s31_s20 = sshll.u32 %s1922_s1, 4  ;;  %s1698_s21 = smov [#allocation5]   ;;  %s32_s20 = int_to_ptr.hbm [resolvable:$true] %s31_s20 }
   0x4   :  { %s33_s22 = sshll.u32 %s1698_s21, 4  ;;  %s18_s25 = sshll.u32 %s1921_s0, 4  ;;  %s34_s22 = int_to_ptr.vmem [resolvable:$true] %s33_s22  ;;  %s19_s25 = int_to_ptr.hbm [resolvable:$true] %s18_s25 }
   0x5   :  { %s1699_s26 = smov 64   ;;  %s1700_s27 = smov 4  }
   0x6   :  { %39 = dma.hbm_to_vmem [thread:$0]  %s32_s20, 1024, %s34_s22, [#allocation6], %s1699_s26, %s1699_s26, %s1700_s27  }
   0x7   :  { %s1701_s28 = smov [#allocation2]   ;;  %s44_s7 = sshll.u32 %s1923_s2, 4  ;;  %s45_s7 = int_to_ptr.hbm [resolvable:$true] %s44_s7 }
   0x8   :  { %s20_s29 = sshll.u32 %s1701_s28, 4  ;;  %s57_s9 = sshll.u32 %s1924_s3, 4  ;;  %s21_s29 = int_to_ptr.vmem [resolvable:$true] %s20_s29  ;;  %s58_s9 = int_to_ptr.hbm [resolvable:$true] %s57_s9 }
   0x9   :  { %26 = dma.hbm_to_vmem [thread:$0]  %s19_s25, 1024, %s21_s29, [#allocation3], %s1699_s26, %s1699_s26, %s1700_s27  }
   0xa   :  { %s1702_s10 = smov [#allocation7]   ;;  %s1703_s0 = smov [#allocation8]  }
   0xb   :  { %s46_s11 = sshll.u32 %s1702_s10, 4  ;;  %s59_s12 = sshll.u32 %s1703_s0, 4  ;;  %s47_s11 = int_to_ptr.vmem [resolvable:$true] %s46_s11  ;;  %s60_s12 = int_to_ptr.vmem [resolvable:$true] %s59_s12 }
   0xc   :  { %52 = dma.hbm_to_vmem [thread:$0]  %s45_s7, 3072, %s47_s11, [#allocation6], %s1699_s26, %s1699_s26, %s1700_s27  }
   0xd   :  { %65 = dma.hbm_to_vmem [thread:$0]  %s58_s9, 3072, %s60_s12, [#allocation9], %s1699_s26, %s1699_s26, %s1700_s27  }
   0xe   :  { %1690 = dma.done.wait [#allocation3], 1024  }
   0xf   :  { %1691 = vsyncadd [#allocation3], 4294966272 }
  0x10   :  { %1692 = dma.done.wait [#allocation6], 4096  }
  0x11   :  { %1693 = vsyncadd [#allocation6], 4294963200 }
  0x12   :  { %1694 = dma.done.wait [#allocation9], 3072  }
  0x13   :  { %1695 = vsyncadd [#allocation9], 4294964224  ;;  %v1749_v0 = vld [vmem:[#allocation5 + $0x38] sm:$0xff]  ;;  %v1752_v1 = vld [vmem:[#allocation5 + $0x30] sm:$0xff]  ;;  %s1197_s20 = sshll.u32 %s1926_s5, 4  ;;  %s1705_s21 = smov 128   ;;  %s1198_s20 = int_to_ptr.hbm [resolvable:$true] %s1197_s20 }
  0x14   :  { %212 = vmatpush.bf16.msra.mxu0 %v1749_v0  ;;  %1534 = vmatpush.bf16.msra.mxu1 %v1749_v0  ;;  %v1758_v2 = vld [vmem:[#allocation5 + $0x28] sm:$0xff]  ;;  %v1764_v3 = vld [vmem:[#allocation5 + $0x20] sm:$0xff]  ;;  %v1770_v4 = vld [vmem:[#allocation5 + $0x18] sm:$0xff]  ;;  %s1706_s22 = smov 8  }
  0x15   :  { %1535 = vmatpush.bf16.msra.mxu2 %v1749_v0  ;;  %1536 = vmatpush.bf16.msra.mxu3 %v1749_v0  ;;  %v1776_v5 = vld [vmem:[#allocation5 + $0x10] sm:$0xff]  ;;  %v1479_v6 = vld [vmem:[#allocation5 + $0x8] sm:$0xff]  ;;  %v1478_v7 = vld [vmem:[#allocation5] sm:$0xff] }
  0x16   :  { %v1501_v8 = vld [vmem:[#allocation8 + $0x38] sm:$0xff]  ;;  %v1785_v10 = vld [vmem:[#allocation2] sm:$0xff]  ;;  %v1787_v11 = vld [vmem:[#allocation2 + $0x10] sm:$0xff] }
  0x17   :  { %v1493_v9 = vld [vmem:[#allocation7 + $0x38] sm:$0xff]  ;;  %v1789_v12 = vld [vmem:[#allocation2 + $0x20] sm:$0xff]  ;;  %v1791_v13 = vld [vmem:[#allocation2 + $0x30] sm:$0xff] }
  0x18   :  { %213 = vmatpush.bf16.msra.mxu0 %v1752_v1  ;;  %1537 = vmatpush.bf16.msra.mxu1 %v1752_v1  ;;  %v1500_v14 = vld [vmem:[#allocation8 + $0x30] sm:$0xff]  ;;  %v1499_v16 = vld [vmem:[#allocation8 + $0x28] sm:$0xff]  ;;  %v1498_v18 = vld [vmem:[#allocation8 + $0x20] sm:$0xff] }
  0x19   :  { %1538 = vmatpush.bf16.msra.mxu2 %v1752_v1  ;;  %1539 = vmatpush.bf16.msra.mxu3 %v1752_v1  ;;  %v1492_v15 = vld [vmem:[#allocation7 + $0x30] sm:$0xff]  ;;  %v1491_v17 = vld [vmem:[#allocation7 + $0x28] sm:$0xff]  ;;  %v1490_v19 = vld [vmem:[#allocation7 + $0x20] sm:$0xff] }
  0x1a   :  { %v1497_v20 = vld [vmem:[#allocation8 + $0x18] sm:$0xff]  ;;  %v1797_v22 = vld [vmem:[#allocation2 + $0x8] sm:$0xff]  ;;  %v1496_v26 = vld [vmem:[#allocation8 + $0x10] sm:$0xff] }
  0x1b   :  { %v1489_v21 = vld [vmem:[#allocation7 + $0x18] sm:$0xff]  ;;  %v1801_v24 = vld [vmem:[#allocation2 + $0x28] sm:$0xff]  ;;  %v1488_v27 = vld [vmem:[#allocation7 + $0x10] sm:$0xff] }
  0x1c   :  { %214 = vmatpush.bf16.msra.mxu0 %v1758_v2  ;;  %1540 = vmatpush.bf16.msra.mxu1 %v1758_v2  ;;  %v1799_v23 = vld [vmem:[#allocation2 + $0x18] sm:$0xff]  ;;  %v1495_v28 = vld [vmem:[#allocation8 + $0x8] sm:$0xff]  ;;  %v1494_v30 = vld [vmem:[#allocation8] sm:$0xff] }
  0x1d   :  { %1541 = vmatpush.bf16.msra.mxu2 %v1758_v2  ;;  %1542 = vmatpush.bf16.msra.mxu3 %v1758_v2  ;;  %v1803_v25 = vld [vmem:[#allocation2 + $0x38] sm:$0xff]  ;;  %v1487_v29 = vld [vmem:[#allocation7 + $0x8] sm:$0xff]  ;;  %v1486_v31 = vld [vmem:[#allocation7] sm:$0xff] }
  0x1e   :  { %v1517_v51 = vld [vmem:[#allocation8 + $0x78] sm:$0xff]  ;;  %v1516_v52 = vld [vmem:[#allocation8 + $0x70] sm:$0xff]  ;;  %v1515_v53 = vld [vmem:[#allocation8 + $0x68] sm:$0xff] }
  0x1f   :  { %v1514_v55 = vld [vmem:[#allocation8 + $0x60] sm:$0xff]  ;;  %v1513_v58 = vld [vmem:[#allocation8 + $0x58] sm:$0xff]  ;;  %v1512_v60 = vld [vmem:[#allocation8 + $0x50] sm:$0xff] }
  0x20   :  { %215 = vmatpush.bf16.msra.mxu0 %v1764_v3  ;;  %1543 = vmatpush.bf16.msra.mxu1 %v1764_v3  ;;  %v1511_v62 = vld [vmem:[#allocation8 + $0x48] sm:$0xff] }
  0x21   :  { %1544 = vmatpush.bf16.msra.mxu2 %v1764_v3  ;;  %1545 = vmatpush.bf16.msra.mxu3 %v1764_v3 }
  0x24   :  { %216 = vmatpush.bf16.msra.mxu0 %v1770_v4  ;;  %1546 = vmatpush.bf16.msra.mxu1 %v1770_v4 }
  0x25   :  { %1547 = vmatpush.bf16.msra.mxu2 %v1770_v4  ;;  %1548 = vmatpush.bf16.msra.mxu3 %v1770_v4 }
  0x28   :  { %217 = vmatpush.bf16.msra.mxu0 %v1776_v5  ;;  %1549 = vmatpush.bf16.msra.mxu1 %v1776_v5 }
  0x29   :  { %1550 = vmatpush.bf16.msra.mxu2 %v1776_v5  ;;  %1551 = vmatpush.bf16.msra.mxu3 %v1776_v5 }
  0x2c   :  { %218 = vmatpush.bf16.msra.mxu0 %v1479_v6  ;;  %1552 = vmatpush.bf16.msra.mxu1 %v1479_v6 }
  0x2d   :  { %1553 = vmatpush.bf16.msra.mxu2 %v1479_v6  ;;  %1554 = vmatpush.bf16.msra.mxu3 %v1479_v6 }
  0x30   :  { %219 = vmatpush.bf16.msra.mxu0 %v1478_v7  ;;  %1555 = vmatpush.bf16.msra.mxu1 %v1478_v7 }
  0x31   :  { %1556 = vmatpush.bf16.msra.mxu2 %v1478_v7  ;;  %1557 = vmatpush.bf16.msra.mxu3 %v1478_v7 }
  0x33   :  { %220 = vmatmul.bf16.vlgmr.msra.gmra.mxu0 %v1785_v10  ;;  %230 = vmatmul.bf16.vlgmr.msra.gmra.mxu1 %v1787_v11 }
  0x34   :  { %349 = vmatpush.bf16.msrb.mxu1 %v1501_v8  ;;  %240 = vmatmul.bf16.vlgmr.msra.gmra.mxu2 %v1789_v12 }
  0x35   :  { %446 = vmatpush.bf16.msrb.mxu2 %v1493_v9  ;;  %250 = vmatmul.bf16.vlgmr.msra.gmra.mxu3 %v1791_v13 }
  0x36   :  { %678 = vmatpush.bf16.msrb.mxu0 %v1517_v51 }
  0x38   :  { %350 = vmatpush.bf16.msrb.mxu1 %v1500_v14 }
  0x39   :  { %447 = vmatpush.bf16.msrb.mxu2 %v1492_v15 }
  0x3a   :  { %679 = vmatpush.bf16.msrb.mxu0 %v1516_v52 }
  0x3c   :  { %351 = vmatpush.bf16.msrb.mxu1 %v1499_v16 }
  0x3d   :  { %448 = vmatpush.bf16.msrb.mxu2 %v1491_v17 }
  0x3e   :  { %680 = vmatpush.bf16.msrb.mxu0 %v1515_v53 }
  0x40   :  { %352 = vmatpush.bf16.msrb.mxu1 %v1498_v18 }
  0x41   :  { %449 = vmatpush.bf16.msrb.mxu2 %v1490_v19 }
  0x42   :  { %681 = vmatpush.bf16.msrb.mxu0 %v1514_v55 }
  0x43   :  { %225 = vmatmul.bf16.gmra.mxu0 %v1797_v22  ;;  %235 = vmatmul.bf16.gmra.mxu1 %v1799_v23 }
  0x44   :  { %353 = vmatpush.bf16.msrb.mxu1 %v1497_v20  ;;  %245 = vmatmul.bf16.gmra.mxu2 %v1801_v24 }
  0x45   :  { %450 = vmatpush.bf16.msrb.mxu2 %v1489_v21  ;;  %255 = vmatmul.bf16.gmra.mxu3 %v1803_v25 }
  0x46   :  { %682 = vmatpush.bf16.msrb.mxu0 %v1513_v58 }
  0x48   :  { %354 = vmatpush.bf16.msrb.mxu1 %v1496_v26 }
  0x49   :  { %451 = vmatpush.bf16.msrb.mxu2 %v1488_v27 }
  0x4a   :  { %683 = vmatpush.bf16.msrb.mxu0 %v1512_v60 }
  0x4c   :  { %355 = vmatpush.bf16.msrb.mxu1 %v1495_v28 }
  0x4d   :  { %452 = vmatpush.bf16.msrb.mxu2 %v1487_v29 }
  0x4e   :  { %684 = vmatpush.bf16.msrb.mxu0 %v1511_v62 }
  0x50   :  { %356 = vmatpush.bf16.msrb.mxu1 %v1494_v30 }
  0x51   :  { %453 = vmatpush.bf16.msrb.mxu2 %v1486_v31 }
  0x53   :  { %357 = vmatmul.bf16.vlgmr.msrb.gmra.mxu1 %v1478_v7 }
  0x63   :  { %362 = vmatmul.bf16.gmra.mxu1 %v1479_v6  ;;  %v1818_v6 = vld [vmem:[%s1925_s4] ss:$0 sm:$0xff] }
  0x73   :  { %367 = vmatmul.bf16.gmra.mxu1 %v1776_v5 }
  0x83   :  { %372 = vmatmul.bf16.gmra.mxu1 %v1770_v4 }
  0x93   :  { %377 = vmatmul.bf16.gmra.mxu1 %v1764_v3 }
  0xa3   :  { %382 = vmatmul.bf16.gmra.mxu1 %v1758_v2 }
  0xb0   :  { %v221_v32 = vpop.f32.mrf.mxu0  ;;  %v231_v37 = vpop.f32.mrf.mxu1 }
  0xb3   :  { %387 = vmatmul.bf16.gmra.mxu1 %v1752_v1  ;;  %v1510_v1 = vld [vmem:[#allocation8 + $0x40] sm:$0xff] }
  0xb4   :  { %685 = vmatpush.bf16.msrb.mxu0 %v1510_v1 }
  0xb7   :  { %v241_v43 = vpop.f32.mrf.mxu2 }
  0xb8   :  { %v223_v33 = vpop.f32.mrf.mxu0  ;;  %v233_v39 = vpop.f32.mrf.mxu1 }
  0xb9   :  { %v261_v34 = vpack.c.bf16 %v223_v33, %v221_v32  ;;  %v263_v40 = vpack.c.bf16 %v233_v39, %v231_v37  ;;  %v251_v49 = vpop.f32.mrf.mxu3 }
  0xbb   :  { %454 = vmatmul.bf16.vlgmr.msrb.gmra.mxu2 %v261_v34 }
  0xbf   :  { %v243_v45 = vpop.f32.mrf.mxu2 }
  0xc0   :  { %v226_v35 = vpop.f32.mrf.mxu0  ;;  %v236_v41 = vpop.f32.mrf.mxu1  ;;  %v265_v46 = vpack.c.bf16 %v243_v45, %v241_v43 }
  0xc1   :  { %v253_v54 = vpop.f32.mrf.mxu3 }
  0xc2   :  { %v267_v56 = vpack.c.bf16 %v253_v54, %v251_v49 }
  0xc3   :  { %392 = vmatmul.bf16.gmra.mxu1 %v1749_v0 }
  0xc7   :  { %v246_v47 = vpop.f32.mrf.mxu2 }
  0xc8   :  { %v228_v36 = vpop.f32.mrf.mxu0  ;;  %v238_v42 = vpop.f32.mrf.mxu1 }
  0xc9   :  { %v262_v38 = vpack.c.bf16 %v228_v36, %v226_v35  ;;  %v264_v44 = vpack.c.bf16 %v238_v42, %v236_v41  ;;  %v256_v57 = vpop.f32.mrf.mxu3 }
  0xcb   :  { %459 = vmatmul.bf16.gmra.mxu2 %v262_v38 }
  0xcf   :  { %v248_v48 = vpop.f32.mrf.mxu2 }
  0xd0   :  { %v266_v50 = vpack.c.bf16 %v248_v48, %v246_v47  ;;  %v358_v59 = vpop.f32.mrf.mxu1 }
  0xd1   :  { %v258_v61 = vpop.f32.mrf.mxu3 }
  0xd2   :  { %v268_v63 = vpack.c.bf16 %v258_v61, %v256_v57 }
  0xd8   :  { %v360_v0 = vpop.f32.mrf.mxu1 }
  0xdb   :  { %464 = vmatmul.bf16.gmra.mxu2 %v263_v40 }
  0xe0   :  { %v363_v2 = vpop.f32.mrf.mxu1 }
  0xe8   :  { %v365_v4 = vpop.f32.mrf.mxu1 }
  0xeb   :  { %469 = vmatmul.bf16.gmra.mxu2 %v264_v44 }
  0xf0   :  { %v368_v14 = vpop.f32.mrf.mxu1 }
  0xf8   :  { %v370_v20 = vpop.f32.mrf.mxu1 }
  0xfb   :  { %474 = vmatmul.bf16.gmra.mxu2 %v265_v46 }
 0x100   :  { %v373_v32 = vpop.f32.mrf.mxu1 }
 0x108   :  { %v375_v37 = vpop.f32.mrf.mxu1 }
 0x10b   :  { %479 = vmatmul.bf16.gmra.mxu2 %v266_v50 }
 0x110   :  { %v378_v45 = vpop.f32.mrf.mxu1 }
 0x118   :  { %v380_v51 = vpop.f32.mrf.mxu1 }
 0x11b   :  { %484 = vmatmul.bf16.gmra.mxu2 %v267_v56 }
 0x120   :  { %v383_v57 = vpop.f32.mrf.mxu1 }
 0x128   :  { %v385_v1 = vpop.f32.mrf.mxu1 }
 0x12b   :  { %489 = vmatmul.bf16.gmra.mxu2 %v268_v63 }
 0x13e   :  { %v455_v3 = vpop.f32.mrf.mxu2 }
 0x13f   :  { %v456_v5 = vadd.f32 %v455_v3, %v358_v59 }
 0x141   :  { %v499_v8 = vadd.f32 %v1818_v6, %v456_v5 }
 0x143   :  { %v515_v16 = vmax.f32 %v499_v8, 0.0  ;;  %v388_v8 = vpop.f32.mrf.mxu1 }
 0x146   :  { %v457_v7 = vpop.f32.mrf.mxu2 }
 0x147   :  { %v458_v9 = vadd.f32 %v457_v7, %v360_v0 }
 0x149   :  { %v500_v15 = vadd.f32 %v1818_v6, %v458_v9 }
 0x14b   :  { %v516_v17 = vmax.f32 %v500_v15, 0.0 }
 0x14d   :  { %v1822_v18 = vpack.c.bf16 %v516_v17, %v515_v16 }
 0x14e   :  { %v460_v19 = vpop.f32.mrf.mxu2 }
 0x14f   :  { %686 = vmatmul.bf16.vlgmr.msrb.gmra.mxu0 %v1822_v18  ;;  %v461_v21 = vadd.f32 %v460_v19, %v363_v2  ;;  %v390_v19 = vpop.f32.mrf.mxu1 }
 0x151   :  { %v501_v27 = vadd.f32 %v1818_v6, %v461_v21 }
 0x153   :  { %v517_v30 = vmax.f32 %v501_v27, 0.0 }
 0x156   :  { %v462_v26 = vpop.f32.mrf.mxu2 }
 0x157   :  { %v463_v28 = vadd.f32 %v462_v26, %v365_v4 }
 0x159   :  { %v502_v29 = vadd.f32 %v1818_v6, %v463_v28 }
 0x15b   :  { %v518_v31 = vmax.f32 %v502_v29, 0.0 }
 0x15d   :  { %v1827_v33 = vpack.c.bf16 %v518_v31, %v517_v30  ;;  %v393_v31 = vpop.f32.mrf.mxu1 }
 0x15e   :  { %v465_v34 = vpop.f32.mrf.mxu2 }
 0x15f   :  { %691 = vmatmul.bf16.gmra.mxu0 %v1827_v33  ;;  %v466_v35 = vadd.f32 %v465_v34, %v368_v14 }
 0x161   :  { %v503_v38 = vadd.f32 %v1818_v6, %v466_v35 }
 0x163   :  { %v519_v41 = vmax.f32 %v503_v38, 0.0 }
 0x166   :  { %v467_v36 = vpop.f32.mrf.mxu2 }
 0x167   :  { %v468_v39 = vadd.f32 %v467_v36, %v370_v20  ;;  %v395_v36 = vpop.f32.mrf.mxu1 }
 0x169   :  { %v504_v40 = vadd.f32 %v1818_v6, %v468_v39 }
 0x16b   :  { %v520_v42 = vmax.f32 %v504_v40, 0.0 }
 0x16d   :  { %v1832_v43 = vpack.c.bf16 %v520_v42, %v519_v41 }
 0x16e   :  { %v470_v44 = vpop.f32.mrf.mxu2 }
 0x16f   :  { %696 = vmatmul.bf16.gmra.mxu0 %v1832_v43  ;;  %v471_v46 = vadd.f32 %v470_v44, %v373_v32 }
 0x171   :  { %v505_v48 = vadd.f32 %v1818_v6, %v471_v46  ;;  %v1504_v46 = vld [vmem:[#allocation7 + $0x50] sm:$0xff] }
 0x173   :  { %v521_v52 = vmax.f32 %v505_v48, 0.0  ;;  %v1502_v48 = vld [vmem:[#allocation7 + $0x40] sm:$0xff] }
 0x176   :  { %v472_v47 = vpop.f32.mrf.mxu2 }
 0x177   :  { %v473_v49 = vadd.f32 %v472_v47, %v375_v37  ;;  %v1503_v47 = vld [vmem:[#allocation7 + $0x48] sm:$0xff] }
 0x179   :  { %v506_v50 = vadd.f32 %v1818_v6, %v473_v49 }
 0x17b   :  { %v522_v53 = vmax.f32 %v506_v50, 0.0 }
 0x17d   :  { %v534_v54 = vpack.c.bf16 %v522_v53, %v521_v52 }
 0x17e   :  { %v475_v55 = vpop.f32.mrf.mxu2 }
 0x17f   :  { %701 = vmatmul.bf16.gmra.mxu0 %v534_v54  ;;  %v476_v56 = vadd.f32 %v475_v55, %v378_v45  ;;  %v1508_v45 = vld [vmem:[#allocation7 + $0x70] sm:$0xff] }
 0x181   :  { %v507_v59 = vadd.f32 %v1818_v6, %v476_v56 }
 0x183   :  { %v523_v62 = vmax.f32 %v507_v59, 0.0 }
 0x186   :  { %v477_v58 = vpop.f32.mrf.mxu2 }
 0x187   :  { %v478_v60 = vadd.f32 %v477_v58, %v380_v51 }
 0x189   :  { %v508_v61 = vadd.f32 %v1818_v6, %v478_v60 }
 0x18b   :  { %v524_v63 = vmax.f32 %v508_v61, 0.0 }
 0x18d   :  { %v535_v0 = vpack.c.bf16 %v524_v63, %v523_v62 }
 0x18e   :  { %v480_v2 = vpop.f32.mrf.mxu2 }
 0x18f   :  { %706 = vmatmul.bf16.gmra.mxu0 %v535_v0  ;;  %v481_v3 = vadd.f32 %v480_v2, %v383_v57  ;;  %v1533_v2 = vld [vmem:[#allocation8 + $0xb8] sm:$0xff] }
 0x191   :  { %v509_v5 = vadd.f32 %v1818_v6, %v481_v3 }
 0x193   :  { %v525_v14 = vmax.f32 %v509_v5, 0.0  ;;  %v1531_v5 = vld [vmem:[#allocation8 + $0xa8] sm:$0xff] }
 0x196   :  { %v482_v4 = vpop.f32.mrf.mxu2 }
 0x197   :  { %v483_v7 = vadd.f32 %v482_v4, %v385_v1  ;;  %v1532_v4 = vld [vmem:[#allocation8 + $0xb0] sm:$0xff] }
 0x199   :  { %v510_v9 = vadd.f32 %v1818_v6, %v483_v7 }
 0x19b   :  { %v526_v15 = vmax.f32 %v510_v9, 0.0 }
 0x19d   :  { %v536_v16 = vpack.c.bf16 %v526_v15, %v525_v14  ;;  %v1529_v14 = vld [vmem:[#allocation8 + $0x98] sm:$0xff] }
 0x19e   :  { %v485_v17 = vpop.f32.mrf.mxu2 }
 0x19f   :  { %711 = vmatmul.bf16.gmra.mxu0 %v536_v16  ;;  %v486_v20 = vadd.f32 %v485_v17, %v388_v8  ;;  %v1530_v8 = vld [vmem:[#allocation8 + $0xa0] sm:$0xff]  ;;  %v1528_v17 = vld [vmem:[#allocation8 + $0x90] sm:$0xff] }
 0x1a1   :  { %v511_v26 = vadd.f32 %v1818_v6, %v486_v20  ;;  %v1527_v20 = vld [vmem:[#allocation8 + $0x88] sm:$0xff] }
 0x1a3   :  { %v527_v29 = vmax.f32 %v511_v26, 0.0  ;;  %v1526_v26 = vld [vmem:[#allocation8 + $0x80] sm:$0xff] }
 0x1a6   :  { %v487_v21 = vpop.f32.mrf.mxu2 }
 0x1a7   :  { %v488_v27 = vadd.f32 %v487_v21, %v390_v19 }
 0x1a9   :  { %v512_v28 = vadd.f32 %v1818_v6, %v488_v27 }
 0x1ab   :  { %v528_v30 = vmax.f32 %v512_v28, 0.0 }
 0x1ad   :  { %v537_v32 = vpack.c.bf16 %v528_v30, %v527_v29 }
 0x1ae   :  { %v490_v34 = vpop.f32.mrf.mxu2 }
 0x1af   :  { %716 = vmatmul.bf16.gmra.mxu0 %v537_v32  ;;  %v491_v35 = vadd.f32 %v490_v34, %v393_v31  ;;  %v1859_v34 = vld [vmem:[%s1925_s4 + $0x1] ss:$0 sm:$0xff] }
 0x1b1   :  { %v513_v38 = vadd.f32 %v1818_v6, %v491_v35 }
 0x1b3   :  { %v529_v41 = vmax.f32 %v513_v38, 0.0 }
 0x1b6   :  { %v492_v37 = vpop.f32.mrf.mxu2 }
 0x1b7   :  { %v493_v39 = vadd.f32 %v492_v37, %v395_v36 }
 0x1b9   :  { %v514_v40 = vadd.f32 %v1818_v6, %v493_v39  ;;  %v1509_v6 = vld [vmem:[#allocation7 + $0x78] sm:$0xff] }
 0x1ba   :  { %775 = vmatpush.bf16.msra.mxu1 %v1509_v6 }
 0x1bb   :  { %v530_v42 = vmax.f32 %v514_v40, 0.0 }
 0x1bd   :  { %v538_v44 = vpack.c.bf16 %v530_v42, %v529_v41 }
 0x1be   :  { %776 = vmatpush.bf16.msra.mxu1 %v1508_v45 }
 0x1bf   :  { %539 = vmatpush.bf16.msrb.mxu3 %v538_v44  ;;  %721 = vmatmul.bf16.gmra.mxu0 %v538_v44 }
 0x1c3   :  { %540 = vmatpush.bf16.msrb.mxu3 %v537_v32 }
 0x1c7   :  { %541 = vmatpush.bf16.msrb.mxu3 %v536_v16 }
 0x1cb   :  { %542 = vmatpush.bf16.msrb.mxu3 %v535_v0 }
 0x1cc   :  { %v687_v16 = vpop.f32.mrf.mxu0 }
 0x1cf   :  { %543 = vmatpush.bf16.msrb.mxu3 %v534_v54 }
 0x1d3   :  { %544 = vmatpush.bf16.msrb.mxu3 %v1832_v43  ;;  %v1507_v43 = vld [vmem:[#allocation7 + $0x68] sm:$0xff] }
 0x1d4   :  { %777 = vmatpush.bf16.msra.mxu1 %v1507_v43  ;;  %v689_v21 = vpop.f32.mrf.mxu0 }
 0x1d7   :  { %545 = vmatpush.bf16.msrb.mxu3 %v1827_v33  ;;  %v1506_v33 = vld [vmem:[#allocation7 + $0x60] sm:$0xff] }
 0x1d8   :  { %778 = vmatpush.bf16.msra.mxu1 %v1506_v33 }
 0x1db   :  { %546 = vmatpush.bf16.msrb.mxu3 %v1822_v18  ;;  %v1505_v18 = vld [vmem:[#allocation7 + $0x58] sm:$0xff] }
 0x1dc   :  { %779 = vmatpush.bf16.msra.mxu1 %v1505_v18  ;;  %v692_v29 = vpop.f32.mrf.mxu0 }
 0x1de   :  { %547 = vmatmul.bf16.vlgmr.msrb.gmra.mxu3 %v1785_v10 }
 0x1df   :  { %1008 = vmatpush.bf16.msra.mxu3 %v1533_v2 }
 0x1e0   :  { %780 = vmatpush.bf16.msra.mxu1 %v1504_v46 }
 0x1e3   :  { %1009 = vmatpush.bf16.msra.mxu3 %v1532_v4 }
 0x1e4   :  { %781 = vmatpush.bf16.msra.mxu1 %v1503_v47  ;;  %v694_v30 = vpop.f32.mrf.mxu0 }
 0x1e7   :  { %1010 = vmatpush.bf16.msra.mxu3 %v1531_v5 }
 0x1e8   :  { %782 = vmatpush.bf16.msra.mxu1 %v1502_v48 }
 0x1eb   :  { %1011 = vmatpush.bf16.msra.mxu3 %v1530_v8 }
 0x1ec   :  { %v697_v38 = vpop.f32.mrf.mxu0 }
 0x1ee   :  { %552 = vmatmul.bf16.gmra.mxu3 %v1797_v22 }
 0x1ef   :  { %1012 = vmatpush.bf16.msra.mxu3 %v1529_v14 }
 0x1f3   :  { %1013 = vmatpush.bf16.msra.mxu3 %v1528_v17 }
 0x1f4   :  { %v699_v6 = vpop.f32.mrf.mxu0 }
 0x1f7   :  { %1014 = vmatpush.bf16.msra.mxu3 %v1527_v20 }
 0x1fb   :  { %1015 = vmatpush.bf16.msra.mxu3 %v1526_v26 }
 0x1fe   :  { %557 = vmatmul.bf16.gmra.mxu3 %v1787_v11 }
 0x20e   :  { %562 = vmatmul.bf16.gmra.mxu3 %v1799_v23 }
 0x21e   :  { %567 = vmatmul.bf16.gmra.mxu3 %v1789_v12 }
 0x22e   :  { %572 = vmatmul.bf16.gmra.mxu3 %v1801_v24 }
 0x23e   :  { %577 = vmatmul.bf16.gmra.mxu3 %v1791_v13 }
 0x24e   :  { %582 = vmatmul.bf16.gmra.mxu3 %v1803_v25 }
 0x261   :  { %v548_v49 = vpop.f32.mrf.mxu3 }
 0x269   :  { %v550_v50 = vpop.f32.mrf.mxu3 }
 0x26a   :  { %v588_v51 = vpack.c.bf16 %v550_v50, %v548_v49  ;;  %v702_v49 = vpop.f32.mrf.mxu0 }
 0x26c   :  { %783 = vmatmul.bf16.vlgmr.msra.gmra.mxu1 %v588_v51 }
 0x271   :  { %v553_v52 = vpop.f32.mrf.mxu3 }
 0x279   :  { %v555_v53 = vpop.f32.mrf.mxu3 }
 0x27a   :  { %v589_v54 = vpack.c.bf16 %v555_v53, %v553_v52  ;;  %v704_v53 = vpop.f32.mrf.mxu0 }
 0x27c   :  { %788 = vmatmul.bf16.gmra.mxu1 %v589_v54 }
 0x281   :  { %v558_v55 = vpop.f32.mrf.mxu3 }
 0x289   :  { %v560_v56 = vpop.f32.mrf.mxu3 }
 0x28a   :  { %v590_v57 = vpack.c.bf16 %v560_v56, %v558_v55 }
 0x28c   :  { %793 = vmatmul.bf16.gmra.mxu1 %v590_v57 }
 0x291   :  { %v563_v58 = vpop.f32.mrf.mxu3 }
 0x299   :  { %v565_v59 = vpop.f32.mrf.mxu3 }
 0x29a   :  { %v591_v60 = vpack.c.bf16 %v565_v59, %v563_v58 }
 0x29c   :  { %798 = vmatmul.bf16.gmra.mxu1 %v591_v60 }
 0x2a1   :  { %v568_v61 = vpop.f32.mrf.mxu3 }
 0x2a9   :  { %v570_v62 = vpop.f32.mrf.mxu3 }
 0x2aa   :  { %v592_v63 = vpack.c.bf16 %v570_v62, %v568_v61  ;;  %v707_v62 = vpop.f32.mrf.mxu0 }
 0x2ac   :  { %803 = vmatmul.bf16.gmra.mxu1 %v592_v63 }
 0x2b1   :  { %v573_v0 = vpop.f32.mrf.mxu3 }
 0x2b2   :  { %v709_v4 = vpop.f32.mrf.mxu0 }
 0x2b9   :  { %v575_v1 = vpop.f32.mrf.mxu3 }
 0x2ba   :  { %v593_v3 = vpack.c.bf16 %v575_v1, %v573_v0 }
 0x2bc   :  { %808 = vmatmul.bf16.gmra.mxu1 %v593_v3 }
 0x2c1   :  { %v578_v7 = vpop.f32.mrf.mxu3 }
 0x2c9   :  { %v580_v9 = vpop.f32.mrf.mxu3 }
 0x2ca   :  { %v594_v15 = vpack.c.bf16 %v580_v9, %v578_v7 }
 0x2cc   :  { %813 = vmatmul.bf16.gmra.mxu1 %v594_v15  ;;  %v712_v15 = vpop.f32.mrf.mxu0 }
 0x2d1   :  { %v583_v19 = vpop.f32.mrf.mxu3 }
 0x2d9   :  { %v585_v27 = vpop.f32.mrf.mxu3 }
 0x2da   :  { %v595_v28 = vpack.c.bf16 %v585_v27, %v583_v19 }
 0x2dc   :  { %818 = vmatmul.bf16.gmra.mxu1 %v595_v28  ;;  %v714_v28 = vpop.f32.mrf.mxu0 }
 0x2e9   :  { %v784_v31 = vpop.f32.mrf.mxu1 }
 0x2ea   :  { %v785_v32 = vadd.f32 %v784_v31, %v687_v16 }
 0x2ec   :  { %v829_v36 = vadd.f32 %v1859_v34, %v785_v32 }
 0x2ee   :  { %v845_v40 = vmax.f32 %v829_v36, 0.0  ;;  %v717_v36 = vpop.f32.mrf.mxu0 }
 0x2f1   :  { %v786_v35 = vpop.f32.mrf.mxu1 }
 0x2f2   :  { %v787_v37 = vadd.f32 %v786_v35, %v689_v21 }
 0x2f4   :  { %v830_v39 = vadd.f32 %v1859_v34, %v787_v37 }
 0x2f6   :  { %v846_v41 = vmax.f32 %v830_v39, 0.0 }
 0x2f8   :  { %v1863_v42 = vpack.c.bf16 %v846_v41, %v845_v40 }
 0x2f9   :  { %v789_v44 = vpop.f32.mrf.mxu1 }
 0x2fa   :  { %1016 = vmatmul.bf16.vlgmr.msra.gmra.mxu3 %v1863_v42  ;;  %v790_v45 = vadd.f32 %v789_v44, %v692_v29  ;;  %v719_v44 = vpop.f32.mrf.mxu0 }
 0x2fc   :  { %v831_v33 = vadd.f32 %v1859_v34, %v790_v45 }
 0x2fe   :  { %v847_v47 = vmax.f32 %v831_v33, 0.0 }
 0x301   :  { %v791_v43 = vpop.f32.mrf.mxu1 }
 0x302   :  { %v792_v18 = vadd.f32 %v791_v43, %v694_v30 }
 0x304   :  { %v832_v46 = vadd.f32 %v1859_v34, %v792_v18 }
 0x306   :  { %v848_v48 = vmax.f32 %v832_v46, 0.0 }
 0x308   :  { %v1868_v50 = vpack.c.bf16 %v848_v48, %v847_v47  ;;  %v722_v48 = vpop.f32.mrf.mxu0 }
 0x309   :  { %v794_v51 = vpop.f32.mrf.mxu1 }
 0x30a   :  { %1021 = vmatmul.bf16.gmra.mxu3 %v1868_v50  ;;  %v795_v52 = vadd.f32 %v794_v51, %v697_v38 }
 0x30c   :  { %v833_v55 = vadd.f32 %v1859_v34, %v795_v52 }
 0x30e   :  { %v849_v58 = vmax.f32 %v833_v55, 0.0 }
 0x311   :  { %v796_v54 = vpop.f32.mrf.mxu1 }
 0x312   :  { %v797_v56 = vadd.f32 %v796_v54, %v699_v6 }
 0x314   :  { %v834_v57 = vadd.f32 %v1859_v34, %v797_v56 }
 0x316   :  { %v850_v59 = vmax.f32 %v834_v57, 0.0 }
 0x318   :  { %v1873_v60 = vpack.c.bf16 %v850_v59, %v849_v58 }
 0x319   :  { %v799_v61 = vpop.f32.mrf.mxu1 }
 0x31a   :  { %1026 = vmatmul.bf16.gmra.mxu3 %v1873_v60  ;;  %v800_v63 = vadd.f32 %v799_v61, %v702_v49 }
 0x31c   :  { %v835_v1 = vadd.f32 %v1859_v34, %v800_v63 }
 0x31e   :  { %v851_v5 = vmax.f32 %v835_v1, 0.0 }
 0x321   :  { %v801_v0 = vpop.f32.mrf.mxu1 }
 0x322   :  { %v802_v2 = vadd.f32 %v801_v0, %v704_v53  ;;  %v724_v53 = vpop.f32.mrf.mxu0 }
 0x324   :  { %v836_v3 = vadd.f32 %v1859_v34, %v802_v2 }
 0x326   :  { %v852_v7 = vmax.f32 %v836_v3, 0.0 }
 0x328   :  { %v864_v8 = vpack.c.bf16 %v852_v7, %v851_v5 }
 0x329   :  { %v804_v9 = vpop.f32.mrf.mxu1 }
 0x32a   :  { %1031 = vmatmul.bf16.gmra.mxu3 %v864_v8  ;;  %v805_v14 = vadd.f32 %v804_v9, %v707_v62  ;;  %v1524_v62 = vld [vmem:[#allocation7 + $0xb0] sm:$0xff] }
 0x32c   :  { %v837_v17 = vadd.f32 %v1859_v34, %v805_v14 }
 0x32e   :  { %v853_v21 = vmax.f32 %v837_v17, 0.0 }
 0x331   :  { %v806_v16 = vpop.f32.mrf.mxu1 }
 0x332   :  { %v807_v19 = vadd.f32 %v806_v16, %v709_v4 }
 0x334   :  { %v838_v20 = vadd.f32 %v1859_v34, %v807_v19 }
 0x336   :  { %v854_v26 = vmax.f32 %v838_v20, 0.0 }
 0x338   :  { %v865_v27 = vpack.c.bf16 %v854_v26, %v853_v21 }
 0x339   :  { %v809_v29 = vpop.f32.mrf.mxu1 }
 0x33a   :  { %1036 = vmatmul.bf16.gmra.mxu3 %v865_v27  ;;  %v810_v30 = vadd.f32 %v809_v29, %v712_v15 }
 0x33c   :  { %v839_v32 = vadd.f32 %v1859_v34, %v810_v30 }
 0x33e   :  { %v855_v38 = vmax.f32 %v839_v32, 0.0 }
 0x341   :  { %v811_v31 = vpop.f32.mrf.mxu1 }
 0x342   :  { %v812_v35 = vadd.f32 %v811_v31, %v714_v28  ;;  %v1900_v31 = vld [vmem:[%s1925_s4 + $0x2] ss:$0 sm:$0xff]  ;;  %s1704_s4 = smov [#allocation10]  }
 0x343   :  { %s1195_s17 = sshll.u32 %s1704_s4, 4  ;;  %s1196_s17 = int_to_ptr.vmem [resolvable:$true] %s1195_s17 }
 0x344   :  { %v840_v37 = vadd.f32 %v1859_v34, %v812_v35 }
 0x346   :  { %v856_v39 = vmax.f32 %v840_v37, 0.0 }
 0x348   :  { %v866_v40 = vpack.c.bf16 %v856_v39, %v855_v38 }
 0x349   :  { %v814_v41 = vpop.f32.mrf.mxu1 }
 0x34a   :  { %1041 = vmatmul.bf16.gmra.mxu3 %v866_v40  ;;  %v815_v6 = vadd.f32 %v814_v41, %v717_v36 }
 0x34c   :  { %v841_v43 = vadd.f32 %v1859_v34, %v815_v6 }
 0x34e   :  { %v857_v46 = vmax.f32 %v841_v43, 0.0 }
 0x351   :  { %v816_v45 = vpop.f32.mrf.mxu1 }
 0x352   :  { %v817_v33 = vadd.f32 %v816_v45, %v719_v44 }
 0x354   :  { %v842_v18 = vadd.f32 %v1859_v34, %v817_v33 }
 0x356   :  { %v858_v47 = vmax.f32 %v842_v18, 0.0 }
 0x358   :  { %v867_v49 = vpack.c.bf16 %v858_v47, %v857_v46 }
 0x359   :  { %v819_v51 = vpop.f32.mrf.mxu1 }
 0x35a   :  { %1046 = vmatmul.bf16.gmra.mxu3 %v867_v49  ;;  %v820_v52 = vadd.f32 %v819_v51, %v722_v48 }
 0x35c   :  { %v843_v55 = vadd.f32 %v1859_v34, %v820_v52 }
 0x35e   :  { %v859_v58 = vmax.f32 %v843_v55, 0.0 }
 0x361   :  { %v821_v54 = vpop.f32.mrf.mxu1 }
 0x362   :  { %v822_v56 = vadd.f32 %v821_v54, %v724_v53 }
 0x364   :  { %v844_v57 = vadd.f32 %v1859_v34, %v822_v56  ;;  %v1525_v34 = vld [vmem:[#allocation7 + $0xb8] sm:$0xff] }
 0x365   :  { %1105 = vmatpush.bf16.msra.mxu0 %v1525_v34 }
 0x366   :  { %v860_v59 = vmax.f32 %v844_v57, 0.0 }
 0x368   :  { %v868_v61 = vpack.c.bf16 %v860_v59, %v859_v58 }
 0x369   :  { %1106 = vmatpush.bf16.msra.mxu0 %v1524_v62 }
 0x36a   :  { %869 = vmatpush.bf16.msra.mxu2 %v868_v61  ;;  %1051 = vmatmul.bf16.gmra.mxu3 %v868_v61 }
 0x36e   :  { %870 = vmatpush.bf16.msra.mxu2 %v867_v49 }
 0x372   :  { %871 = vmatpush.bf16.msra.mxu2 %v866_v40 }
 0x376   :  { %872 = vmatpush.bf16.msra.mxu2 %v865_v27 }
 0x37a   :  { %873 = vmatpush.bf16.msra.mxu2 %v864_v8 }
 0x37d   :  { %v1017_v21 = vpop.f32.mrf.mxu3 }
 0x37e   :  { %874 = vmatpush.bf16.msra.mxu2 %v1873_v60  ;;  %v1523_v60 = vld [vmem:[#allocation7 + $0xa8] sm:$0xff] }
 0x37f   :  { %1107 = vmatpush.bf16.msra.mxu0 %v1523_v60 }
 0x382   :  { %875 = vmatpush.bf16.msra.mxu2 %v1868_v50  ;;  %v1522_v50 = vld [vmem:[#allocation7 + $0xa0] sm:$0xff] }
 0x383   :  { %1108 = vmatpush.bf16.msra.mxu0 %v1522_v50 }
 0x385   :  { %v1019_v27 = vpop.f32.mrf.mxu3 }
 0x386   :  { %876 = vmatpush.bf16.msra.mxu2 %v1863_v42  ;;  %v1521_v42 = vld [vmem:[#allocation7 + $0x98] sm:$0xff] }
 0x387   :  { %1109 = vmatpush.bf16.msra.mxu0 %v1521_v42 }
 0x389   :  { %877 = vmatmul.bf16.vlgmr.msra.gmra.mxu2 %v1785_v10  ;;  %v1520_v10 = vld [vmem:[#allocation7 + $0x90] sm:$0xff] }
 0x38b   :  { %1110 = vmatpush.bf16.msra.mxu0 %v1520_v10 }
 0x38d   :  { %v1022_v30 = vpop.f32.mrf.mxu3 }
 0x395   :  { %v1024_v32 = vpop.f32.mrf.mxu3 }
 0x399   :  { %882 = vmatmul.bf16.gmra.mxu2 %v1797_v22  ;;  %v1518_v22 = vld [vmem:[#allocation7 + $0x80] sm:$0xff] }
 0x39d   :  { %v1027_v40 = vpop.f32.mrf.mxu3 }
 0x3a5   :  { %v1029_v43 = vpop.f32.mrf.mxu3 }
 0x3a9   :  { %887 = vmatmul.bf16.gmra.mxu2 %v1787_v11  ;;  %v1519_v11 = vld [vmem:[#allocation7 + $0x88] sm:$0xff] }
 0x3aa   :  { %1111 = vmatpush.bf16.msra.mxu0 %v1519_v11 }
 0x3ad   :  { %v1032_v47 = vpop.f32.mrf.mxu3 }
 0x3ae   :  { %1112 = vmatpush.bf16.msra.mxu0 %v1518_v22 }
 0x3b5   :  { %v1034_v52 = vpop.f32.mrf.mxu3 }
 0x3b9   :  { %892 = vmatmul.bf16.gmra.mxu2 %v1799_v23 }
 0x3bd   :  { %v1037_v58 = vpop.f32.mrf.mxu3 }
 0x3c5   :  { %v1039_v60 = vpop.f32.mrf.mxu3 }
 0x3c9   :  { %897 = vmatmul.bf16.gmra.mxu2 %v1789_v12 }
 0x3cd   :  { %v1042_v11 = vpop.f32.mrf.mxu3 }
 0x3d9   :  { %902 = vmatmul.bf16.gmra.mxu2 %v1801_v24 }
 0x3e9   :  { %907 = vmatmul.bf16.gmra.mxu2 %v1791_v13 }
 0x3f9   :  { %912 = vmatmul.bf16.gmra.mxu2 %v1803_v25 }
 0x40c   :  { %v878_v12 = vpop.f32.mrf.mxu2 }
 0x414   :  { %v880_v23 = vpop.f32.mrf.mxu2 }
 0x415   :  { %v918_v24 = vpack.c.bf16 %v880_v23, %v878_v12 }
 0x417   :  { %1113 = vmatmul.bf16.vlgmr.msra.gmra.mxu0 %v918_v24  ;;  %v1044_v24 = vpop.f32.mrf.mxu3 }
 0x41c   :  { %v883_v63 = vpop.f32.mrf.mxu2 }
 0x424   :  { %v885_v0 = vpop.f32.mrf.mxu2 }
 0x425   :  { %v919_v1 = vpack.c.bf16 %v885_v0, %v883_v63 }
 0x427   :  { %1118 = vmatmul.bf16.gmra.mxu0 %v919_v1 }
 0x42c   :  { %v888_v2 = vpop.f32.mrf.mxu2 }
 0x434   :  { %v890_v3 = vpop.f32.mrf.mxu2 }
 0x435   :  { %v920_v4 = vpack.c.bf16 %v890_v3, %v888_v2 }
 0x437   :  { %1123 = vmatmul.bf16.gmra.mxu0 %v920_v4  ;;  %v1047_v4 = vpop.f32.mrf.mxu3 }
 0x43c   :  { %v893_v13 = vpop.f32.mrf.mxu2 }
 0x444   :  { %v895_v5 = vpop.f32.mrf.mxu2 }
 0x445   :  { %v921_v7 = vpack.c.bf16 %v895_v5, %v893_v13 }
 0x447   :  { %1128 = vmatmul.bf16.gmra.mxu0 %v921_v7 }
 0x44c   :  { %v898_v8 = vpop.f32.mrf.mxu2 }
 0x454   :  { %v900_v9 = vpop.f32.mrf.mxu2 }
 0x455   :  { %v922_v14 = vpack.c.bf16 %v900_v9, %v898_v8  ;;  %v1049_v9 = vpop.f32.mrf.mxu3 }
 0x457   :  { %1133 = vmatmul.bf16.gmra.mxu0 %v922_v14 }
 0x45c   :  { %v903_v25 = vpop.f32.mrf.mxu2 }
 0x464   :  { %v905_v15 = vpop.f32.mrf.mxu2 }
 0x465   :  { %v923_v16 = vpack.c.bf16 %v905_v15, %v903_v25 }
 0x467   :  { %1138 = vmatmul.bf16.gmra.mxu0 %v923_v16  ;;  %v1052_v16 = vpop.f32.mrf.mxu3 }
 0x46c   :  { %v908_v17 = vpop.f32.mrf.mxu2 }
 0x474   :  { %v910_v19 = vpop.f32.mrf.mxu2 }
 0x475   :  { %v924_v20 = vpack.c.bf16 %v910_v19, %v908_v17 }
 0x477   :  { %1143 = vmatmul.bf16.gmra.mxu0 %v924_v20 }
 0x47c   :  { %v913_v26 = vpop.f32.mrf.mxu2 }
 0x484   :  { %v915_v28 = vpop.f32.mrf.mxu2 }
 0x485   :  { %v925_v29 = vpack.c.bf16 %v915_v28, %v913_v26 }
 0x487   :  { %1148 = vmatmul.bf16.gmra.mxu0 %v925_v29 }
 0x494   :  { %v1114_v35 = vpop.f32.mrf.mxu0 }
 0x495   :  { %v1115_v36 = vadd.f32 %v1114_v35, %v1017_v21  ;;  %v1054_v21 = vpop.f32.mrf.mxu3 }
 0x497   :  { %v1159_v37 = vadd.f32 %v1900_v31, %v1115_v36 }
 0x499   :  { %1175 = vst [vmem:[#allocation10] sm:$0xff] %v1159_v37 }
 0x49c   :  { %v1116_v38 = vpop.f32.mrf.mxu0 }
 0x49d   :  { %v1117_v39 = vadd.f32 %v1116_v38, %v1019_v27 }
 0x49f   :  { %v1160_v41 = vadd.f32 %v1900_v31, %v1117_v39 }
 0x4a1   :  { %1176 = vst [vmem:[#allocation10 + $0x8] sm:$0xff] %v1160_v41 }
 0x4a4   :  { %v1119_v44 = vpop.f32.mrf.mxu0 }
 0x4a5   :  { %v1120_v6 = vadd.f32 %v1119_v44, %v1022_v30 }
 0x4a7   :  { %v1161_v45 = vadd.f32 %v1900_v31, %v1120_v6 }
 0x4a9   :  { %1177 = vst [vmem:[#allocation10 + $0x10] sm:$0xff] %v1161_v45 }
 0x4ac   :  { %v1121_v33 = vpop.f32.mrf.mxu0 }
 0x4ad   :  { %v1122_v18 = vadd.f32 %v1121_v33, %v1024_v32 }
 0x4af   :  { %v1162_v46 = vadd.f32 %v1900_v31, %v1122_v18 }
 0x4b1   :  { %1178 = vst [vmem:[#allocation10 + $0x18] sm:$0xff] %v1162_v46 }
 0x4b4   :  { %v1124_v48 = vpop.f32.mrf.mxu0 }
 0x4b5   :  { %v1125_v49 = vadd.f32 %v1124_v48, %v1027_v40 }
 0x4b7   :  { %v1163_v51 = vadd.f32 %v1900_v31, %v1125_v49 }
 0x4b9   :  { %1179 = vst [vmem:[#allocation10 + $0x20] sm:$0xff] %v1163_v51 }
 0x4bc   :  { %v1126_v53 = vpop.f32.mrf.mxu0 }
 0x4bd   :  { %v1127_v54 = vadd.f32 %v1126_v53, %v1029_v43 }
 0x4bf   :  { %v1164_v55 = vadd.f32 %v1900_v31, %v1127_v54 }
 0x4c1   :  { %1180 = vst [vmem:[#allocation10 + $0x28] sm:$0xff] %v1164_v55 }
 0x4c4   :  { %v1129_v56 = vpop.f32.mrf.mxu0 }
 0x4c5   :  { %v1130_v57 = vadd.f32 %v1129_v56, %v1032_v47 }
 0x4c7   :  { %v1165_v59 = vadd.f32 %v1900_v31, %v1130_v57 }
 0x4c9   :  { %1181 = vst [vmem:[#allocation10 + $0x30] sm:$0xff] %v1165_v59 }
 0x4cc   :  { %v1131_v61 = vpop.f32.mrf.mxu0 }
 0x4cd   :  { %v1132_v34 = vadd.f32 %v1131_v61, %v1034_v52 }
 0x4cf   :  { %v1166_v62 = vadd.f32 %v1900_v31, %v1132_v34 }
 0x4d1   :  { %1182 = vst [vmem:[#allocation10 + $0x38] sm:$0xff] %v1166_v62 }
 0x4d4   :  { %v1134_v50 = vpop.f32.mrf.mxu0 }
 0x4d5   :  { %v1135_v42 = vadd.f32 %v1134_v50, %v1037_v58 }
 0x4d7   :  { %v1167_v10 = vadd.f32 %v1900_v31, %v1135_v42 }
 0x4d9   :  { %1183 = vst [vmem:[#allocation10 + $0x40] sm:$0xff] %v1167_v10 }
 0x4dc   :  { %v1136_v22 = vpop.f32.mrf.mxu0 }
 0x4dd   :  { %v1137_v12 = vadd.f32 %v1136_v22, %v1039_v60 }
 0x4df   :  { %v1168_v23 = vadd.f32 %v1900_v31, %v1137_v12 }
 0x4e1   :  { %1184 = vst [vmem:[#allocation10 + $0x48] sm:$0xff] %v1168_v23 }
 0x4e4   :  { %v1139_v63 = vpop.f32.mrf.mxu0 }
 0x4e5   :  { %v1140_v0 = vadd.f32 %v1139_v63, %v1042_v11 }
 0x4e7   :  { %v1169_v1 = vadd.f32 %v1900_v31, %v1140_v0 }
 0x4e9   :  { %1185 = vst [vmem:[#allocation10 + $0x50] sm:$0xff] %v1169_v1 }
 0x4ec   :  { %v1141_v2 = vpop.f32.mrf.mxu0 }
 0x4ed   :  { %v1142_v3 = vadd.f32 %v1141_v2, %v1044_v24 }
 0x4ef   :  { %v1170_v13 = vadd.f32 %v1900_v31, %v1142_v3 }
 0x4f1   :  { %1186 = vst [vmem:[#allocation10 + $0x58] sm:$0xff] %v1170_v13 }
 0x4f4   :  { %v1144_v5 = vpop.f32.mrf.mxu0 }
 0x4f5   :  { %v1145_v7 = vadd.f32 %v1144_v5, %v1047_v4 }
 0x4f7   :  { %v1171_v8 = vadd.f32 %v1900_v31, %v1145_v7 }
 0x4f9   :  { %1187 = vst [vmem:[#allocation10 + $0x60] sm:$0xff] %v1171_v8 }
 0x4fc   :  { %v1146_v14 = vpop.f32.mrf.mxu0 }
 0x4fd   :  { %v1147_v25 = vadd.f32 %v1146_v14, %v1049_v9 }
 0x4ff   :  { %v1172_v15 = vadd.f32 %v1900_v31, %v1147_v25 }
 0x501   :  { %1188 = vst [vmem:[#allocation10 + $0x68] sm:$0xff] %v1172_v15 }
 0x504   :  { %v1149_v17 = vpop.f32.mrf.mxu0 }
 0x505   :  { %v1150_v19 = vadd.f32 %v1149_v17, %v1052_v16 }
 0x507   :  { %v1173_v20 = vadd.f32 %v1900_v31, %v1150_v19 }
 0x509   :  { %1189 = vst [vmem:[#allocation10 + $0x70] sm:$0xff] %v1173_v20 }
 0x50c   :  { %v1151_v26 = vpop.f32.mrf.mxu0 }
 0x50d   :  { %v1152_v27 = vadd.f32 %v1151_v26, %v1054_v21 }
 0x50f   :  { %v1174_v28 = vadd.f32 %v1900_v31, %v1152_v27 }
 0x511   :  { %1190 = vst [vmem:[#allocation10 + $0x78] sm:$0xff] %v1174_v28 }
 0x512   :  { %1203 = dma.vmem_to_hbm [thread:$0]  %s1196_s17, 2048, %s1198_s20, [#allocation4], %s1705_s21, %s1705_s21, %s1706_s22  }
 0x513   :  { %1696 = dma.done.wait [#allocation4], 2048  }
 0x514   :  { %1697 = vsyncadd [#allocation4], 4294965248 }
 0x515   :  { %1208 = vsyncpa [#allocation3], 1 }
 0x516   :  { %1209 = vsyncpa [#allocation6], 1 }
 0x517   :  { %1210 = vsyncpa [#allocation9], 1 }
 0x518   :  { %1211 = vsyncpa [#allocation4], 1 }

</bundles_post_ra>
